<compile_context>
chip_gen: v7x
topology: tpu7x:2x2x1
jax: 0.10.0
libtpu: 0.0.40
codegen_flags: <defaults>
</compile_context>

<pallas_src>
import jax
import jax.numpy as jnp
import numpy as np
from jax.experimental import pallas as pl
from jax.experimental.pallas import tpu as pltpu

_SUBLANE = 8     # vreg sublane width -> second-to-last dim alignment
_LANE = 128      # vreg lane width    -> last-dim alignment (VMEM accounting only)
_MAX_TILE = 4096  # rows per grid step; keeps in-VMEM intermediates small at any width


def _round_up(x, m):
    return ((x + m - 1) // m) * m


def _actor_kernel(x_ref,
                  w_in_ref, b_in_ref,
                  w1_ref, b1_ref,
                  w2_ref, b2_ref,
                  w_out_ref, b_out_ref,
                  o_ref):
    """Whole 4-layer MLP fused in VMEM: 4 MXU matmuls, f32 bias adds + ReLUs."""
    cdt = w_in_ref.dtype  # matmul-input dtype (bf16); accumulation stays f32

    h = jnp.dot(x_ref[...], w_in_ref[...], preferred_element_type=jnp.float32)
    h = jnp.maximum(h + b_in_ref[...], 0.0)

    h = jnp.dot(h.astype(cdt), w1_ref[...], preferred_element_type=jnp.float32)
    h = jnp.maximum(h + b1_ref[...], 0.0)

    h = jnp.dot(h.astype(cdt), w2_ref[...], preferred_element_type=jnp.float32)
    h = jnp.maximum(h + b2_ref[...], 0.0)

    o_ref[...] = (jnp.dot(h.astype(cdt), w_out_ref[...],
                          preferred_element_type=jnp.float32)
                  + b_out_ref[...])


def _num_tensorcores():
    """2 on v7x-style dual-TensorCore chips, else 1 (v5e/v6e)."""
    try:
        kind = (jax.devices()[0].device_kind or "").lower()
    except Exception:
        return 1
    return 2 if "v7" in kind else 1


def _choose_block_b(batch, n_cores):
    """Single large tile on 1-TC chips; exactly n_cores tiles on multi-TC chips."""
    b8 = _round_up(max(batch, _SUBLANE), _SUBLANE)
    if n_cores > 1 and b8 > 256:
        b8 = _round_up(-(-b8 // n_cores), _SUBLANE)   # ceil-div, sublane aligned
    return min(b8, _MAX_TILE)


def prepare_actor_params(params, compute_dtype=jnp.bfloat16):
    """One-time weight cast (do at init / after each optimizer step).

    No feature-dim padding: all arrays keep their natural HBM shapes.
    Weights -> compute dtype (MXU inputs); biases stay f32 (VPU adds).
    """
    return {
        "w_in": params["w_in"].astype(compute_dtype),
        "w1": params["w1"].astype(compute_dtype),
        "w2": params["w2"].astype(compute_dtype),
        "w_out": params["w_out"].astype(compute_dtype),
        "b_in": params["b_in"].astype(jnp.float32),
        "b1": params["b1"].astype(jnp.float32),
        "b2": params["b2"].astype(jnp.float32),
        "b_out": params["b_out"].astype(jnp.float32),
    }


def actor_forward(state, prepared, *, block_b=None):
    """Pallas forward of ActorNetwork.

    state:    (B, 1, n_input) or (B, n_input) array.
    prepared: output of prepare_actor_params (bf16 weights, f32 biases,
              weights stored transposed as (in_features, out_features),
              biases as (1, out_features)).
    """
    x = state
    if x.ndim == 3 and x.shape[1] == 1:
        x = jnp.squeeze(x, axis=1)          # torch.squeeze(state, 1)

    w_in, w1, w2, w_out = prepared["w_in"], prepared["w1"], prepared["w2"], prepared["w_out"]
    b_in, b1, b2, b_out = prepared["b_in"], prepared["b1"], prepared["b2"], prepared["b_out"]
    compute_dtype = w_in.dtype

    B, n_in = x.shape
    n_feat = w_in.shape[1]
    n_out = w_out.shape[1]
    assert w_in.shape[0] == n_in

    # Cast input straight to the matmul dtype (no f32 round-trip, no lane padding).
    x = x.astype(compute_dtype)

    # --- batch tiling (only the batch dim is ever padded) ---
    if block_b is None:
        block_b = _choose_block_b(B, _num_tensorcores())
    block_b = max(_round_up(block_b, _SUBLANE), _SUBLANE)
    B_pad = _round_up(max(B, block_b), block_b)
    if B_pad != B:
        x = jnp.pad(x, ((0, B_pad - B), (0, 0)))

    grid = (B_pad // block_b,)
    row_map = lambda i: (i, 0)
    rep_map = lambda i: (0, 0)

    # --- VMEM budget: account for in-VMEM lane(128)/sublane(8) tile padding ---
    def _tile_bytes(rows, cols, itemsize):
        return _round_up(rows, _SUBLANE) * _round_up(cols, _LANE) * itemsize

    cdb = jnp.dtype(compute_dtype).itemsize
    weight_bytes = (_tile_bytes(n_in, n_feat, cdb)
                    + 2 * _tile_bytes(n_feat, n_feat, cdb)
                    + _tile_bytes(n_feat, n_out, cdb))
    bias_bytes = 3 * _tile_bytes(1, n_feat, 4) + _tile_bytes(1, n_out, 4)
    io_bytes = _tile_bytes(block_b, n_in, cdb) + _tile_bytes(block_b, n_out, 4)
    interm_bytes = 3 * (_tile_bytes(block_b, n_feat, 4) + _tile_bytes(block_b, n_feat, cdb))
    vmem_budget = 2 * (weight_bytes + bias_bytes + io_bytes) + interm_bytes
    vmem_limit = int(min(max(2 * vmem_budget, 16 << 20), 48 << 20))

    in_specs = [
        pl.BlockSpec((block_b, n_in), row_map),       # x tile walks the batch
        pl.BlockSpec((n_in, n_feat), rep_map),        # w_in (grid-invariant)
        pl.BlockSpec((1, n_feat), rep_map),           # b_in
        pl.BlockSpec((n_feat, n_feat), rep_map),      # w1
        pl.BlockSpec((1, n_feat), rep_map),           # b1
        pl.BlockSpec((n_feat, n_feat), rep_map),      # w2
        pl.BlockSpec((1, n_feat), rep_map),           # b2
        pl.BlockSpec((n_feat, n_out), rep_map),       # w_out
        pl.BlockSpec((1, n_out), rep_map),            # b_out
    ]
    out_spec = pl.BlockSpec((block_b, n_out), row_map)   # only useful bytes written back

    out = pl.pallas_call(
        _actor_kernel,
        out_shape=jax.ShapeDtypeStruct((B_pad, n_out), jnp.float32),
        grid_spec=pltpu.PrefetchScalarGridSpec(
            num_scalar_prefetch=0,
            grid=grid,
            in_specs=in_specs,
            out_specs=out_spec,
        ),
        compiler_params=pltpu.CompilerParams(
            dimension_semantics=("parallel",),
            vmem_limit_bytes=vmem_limit,
        ),
    )(x, w_in, b_in, w1, b1, w2, b2, w_out, b_out)

    return out[:B] if B_pad != B else out


def _xavier_uniform(key, fan_in, fan_out, gain):
    # torch.nn.init.xavier_uniform_ semantics; stored transposed as (in, out).
    bound = gain * np.sqrt(6.0 / (fan_in + fan_out))
    return jax.random.uniform(key, (fan_in, fan_out), jnp.float32, -bound, bound)


def init_actor_params(key, n_input, n_features, n_output):
    ks = jax.random.split(key, 8)
    relu_gain = np.sqrt(2.0)   # calculate_gain('relu')
    lin_gain = 1.0             # calculate_gain('linear')

    def linear_bias(key, fan_in, fan_out):
        # PyTorch nn.Linear default bias init: U(-1/sqrt(fan_in), 1/sqrt(fan_in))
        b = 1.0 / np.sqrt(fan_in)
        return jax.random.uniform(key, (1, fan_out), jnp.float32, -b, b)

    return {
        "w_in":  _xavier_uniform(ks[0], n_input, n_features, relu_gain),
        "b_in":  linear_bias(ks[1], n_input, n_features),
        "w1":    _xavier_uniform(ks[2], n_features, n_features, relu_gain),
        "b1":    linear_bias(ks[3], n_features, n_features),
        "w2":    _xavier_uniform(ks[4], n_features, n_features, relu_gain),
        "b2":    linear_bias(ks[5], n_features, n_features),
        "w_out": _xavier_uniform(ks[6], n_features, n_output, lin_gain),
        "b_out": linear_bias(ks[7], n_features, n_output),
    }


def _squeeze_state(state):
    if state.ndim == 3 and state.shape[1] == 1:
        state = jnp.squeeze(state, axis=1)
    return state.astype(jnp.float32)


def _reference_forward_f32(state, p):
    # Exact PyTorch-module math (all float32).
    x = _squeeze_state(state)
    h = jax.nn.relu(x @ p["w_in"] + p["b_in"])
    h = jax.nn.relu(h @ p["w1"] + p["b1"])
    h = jax.nn.relu(h @ p["w2"] + p["b2"])
    return h @ p["w_out"] + p["b_out"]


def _reference_forward_mixed(state, p, compute_dtype=jnp.bfloat16):
    # Mirrors the kernel math: bf16 matmul inputs, f32 accumulation/bias/ReLU.
    x = _squeeze_state(state)

    def lin(a, w, b):
        return jnp.dot(a.astype(compute_dtype), w.astype(compute_dtype),
                       preferred_element_type=jnp.float32) + b

    h = jax.nn.relu(lin(x, p["w_in"], p["b_in"]))
    h = jax.nn.relu(lin(h, p["w1"], p["b1"]))
    h = jax.nn.relu(lin(h, p["w2"], p["b2"]))
    return lin(h, p["w_out"], p["b_out"])


if __name__ == "__main__":
    key = jax.random.PRNGKey(0)
    k_params, k_state, k_state2 = jax.random.split(key, 3)

    batch, n_input, n_features, n_output = 8, 16, 32, 4
    params = init_actor_params(k_params, n_input, n_features, n_output)
    prepared = prepare_actor_params(params)   # one-time weight prep (hoisted out of forward)

    # state shaped (B, 1, n_input), like the mushroom_rl observation that gets squeeze(1)'d
    state = jax.random.normal(k_state, (batch, 1, n_input), jnp.float32)

    actions = actor_forward(state, prepared)
    actions = jax.block_until_ready(actions)
    assert actions.shape == (batch, n_output)

    # Tight check against the kernel's exact mixed-precision math.
    ref_mixed = _reference_forward_mixed(state, params)
    assert jnp.allclose(actions, ref_mixed, atol=5e-4, rtol=5e-4), \
        float(jnp.max(jnp.abs(actions - ref_mixed)))

    # Loose semantic check against the full-f32 PyTorch-equivalent forward.
    ref_f32 = _reference_forward_f32(state, params)
    assert jnp.allclose(actions, ref_f32, atol=5e-2, rtol=5e-2), \
        float(jnp.max(jnp.abs(actions - ref_f32)))

    # Exercise the batch-padding + multi-grid-step path (B=20, 8-row tiles -> 3 steps).
    state2 = jax.random.normal(k_state2, (20, 1, n_input), jnp.float32)
    actions2 = jax.block_until_ready(actor_forward(state2, prepared, block_b=8))
    ref2 = _reference_forward_mixed(state2, params)
    assert actions2.shape == (20, n_output)
    assert jnp.allclose(actions2, ref2, atol=5e-4, rtol=5e-4), \
        float(jnp.max(jnp.abs(actions2 - ref2)))

    # Auto tile selection with a non-multiple-of-8 batch (single big tile / 2 on v7x).
    actions3 = jax.block_until_ready(actor_forward(state2, prepared))
    assert actions3.shape == (20, n_output)
    assert jnp.allclose(actions3, ref2, atol=5e-4, rtol=5e-4), \
        float(jnp.max(jnp.abs(actions3 - ref2)))

    print("KERNEL_OK")
</pallas_src>

<mosaic_0001>
module attributes {stable_mosaic.version = 11 : i64} {
  func.func @_actor_kernel(%arg0: i32, %arg1: memref<8x16xbf16, #tpu.memory_space<vmem>>, %arg2: memref<16x32xbf16, #tpu.memory_space<vmem>>, %arg3: memref<1x32xf32, #tpu.memory_space<vmem>>, %arg4: memref<32x32xbf16, #tpu.memory_space<vmem>>, %arg5: memref<1x32xf32, #tpu.memory_space<vmem>>, %arg6: memref<32x32xbf16, #tpu.memory_space<vmem>>, %arg7: memref<1x32xf32, #tpu.memory_space<vmem>>, %arg8: memref<32x4xbf16, #tpu.memory_space<vmem>>, %arg9: memref<1x4xf32, #tpu.memory_space<vmem>>, %arg10: memref<8x4xf32, #tpu.memory_space<vmem>>) attributes {dimension_semantics = [#tpu.dimension_semantics<parallel>], iteration_bounds = array<i64: 1>, scalar_prefetch = 0 : i64, scratch_operands = 0 : i64, tpu.core_type = #tpu.core_type<tc>, window_params = [{transform_indices = @transform_0, window_bounds = array<i64: 8, 16>}, {pipeline_mode = #tpu.pipeline_mode<synchronous>, transform_indices = @transform_1, window_bounds = array<i64: 16, 32>}, {pipeline_mode = #tpu.pipeline_mode<synchronous>, transform_indices = @transform_2, window_bounds = array<i64: 1, 32>}, {pipeline_mode = #tpu.pipeline_mode<synchronous>, transform_indices = @transform_3, window_bounds = array<i64: 32, 32>}, {pipeline_mode = #tpu.pipeline_mode<synchronous>, transform_indices = @transform_4, window_bounds = array<i64: 1, 32>}, {pipeline_mode = #tpu.pipeline_mode<synchronous>, transform_indices = @transform_5, window_bounds = array<i64: 32, 32>}, {pipeline_mode = #tpu.pipeline_mode<synchronous>, transform_indices = @transform_6, window_bounds = array<i64: 1, 32>}, {pipeline_mode = #tpu.pipeline_mode<synchronous>, transform_indices = @transform_7, window_bounds = array<i64: 32, 4>}, {pipeline_mode = #tpu.pipeline_mode<synchronous>, transform_indices = @transform_8, window_bounds = array<i64: 1, 4>}, {transform_indices = @transform_9, window_bounds = array<i64: 8, 4>}]} {
    %c0 = arith.constant 0 : index
    %c0_0 = arith.constant 0 : index
    %0 = vector.load %arg1[%c0, %c0_0] : memref<8x16xbf16, #tpu.memory_space<vmem>>, vector<8x16xbf16>
    %c0_1 = arith.constant 0 : index
    %c0_2 = arith.constant 0 : index
    %1 = vector.load %arg2[%c0_1, %c0_2] : memref<16x32xbf16, #tpu.memory_space<vmem>>, vector<16x32xbf16>
    %cst = arith.constant dense<0.000000e+00> : vector<8x32xf32>
    %2 = tpu.matmul %0, %1, %cst {dimension_numbers = #tpu.dot_dimension_numbers<[1], [0], [0], [1], [0, 0, 1, 1], [], []>} : vector<8x16xbf16>, vector<16x32xbf16>, vector<8x32xf32> -> vector<8x32xf32>
    %c0_3 = arith.constant 0 : index
    %c0_4 = arith.constant 0 : index
    %3 = vector.load %arg3[%c0_3, %c0_4] : memref<1x32xf32, #tpu.memory_space<vmem>>, vector<1x32xf32>
    %4 = vector.broadcast %3 : vector<1x32xf32> to vector<8x32xf32>
    %5 = arith.addf %2, %4 : vector<8x32xf32>
    %cst_5 = arith.constant 0.000000e+00 : f32
    %6 = vector.broadcast %cst_5 : f32 to vector<8x32xf32>
    %7 = arith.maximumf %5, %6 : vector<8x32xf32>
    %8 = arith.truncf %7 : vector<8x32xf32> to vector<8x32xbf16>
    %c0_6 = arith.constant 0 : index
    %c0_7 = arith.constant 0 : index
    %9 = vector.load %arg4[%c0_6, %c0_7] : memref<32x32xbf16, #tpu.memory_space<vmem>>, vector<32x32xbf16>
    %cst_8 = arith.constant dense<0.000000e+00> : vector<8x32xf32>
    %10 = tpu.matmul %8, %9, %cst_8 {dimension_numbers = #tpu.dot_dimension_numbers<[1], [0], [0], [1], [0, 0, 1, 1], [], []>} : vector<8x32xbf16>, vector<32x32xbf16>, vector<8x32xf32> -> vector<8x32xf32>
    %c0_9 = arith.constant 0 : index
    %c0_10 = arith.constant 0 : index
    %11 = vector.load %arg5[%c0_9, %c0_10] : memref<1x32xf32, #tpu.memory_space<vmem>>, vector<1x32xf32>
    %12 = vector.broadcast %11 : vector<1x32xf32> to vector<8x32xf32>
    %13 = arith.addf %10, %12 : vector<8x32xf32>
    %cst_11 = arith.constant 0.000000e+00 : f32
    %14 = vector.broadcast %cst_11 : f32 to vector<8x32xf32>
    %15 = arith.maximumf %13, %14 : vector<8x32xf32>
    %16 = arith.truncf %15 : vector<8x32xf32> to vector<8x32xbf16>
    %c0_12 = arith.constant 0 : index
    %c0_13 = arith.constant 0 : index
    %17 = vector.load %arg6[%c0_12, %c0_13] : memref<32x32xbf16, #tpu.memory_space<vmem>>, vector<32x32xbf16>
    %cst_14 = arith.constant dense<0.000000e+00> : vector<8x32xf32>
    %18 = tpu.matmul %16, %17, %cst_14 {dimension_numbers = #tpu.dot_dimension_numbers<[1], [0], [0], [1], [0, 0, 1, 1], [], []>} : vector<8x32xbf16>, vector<32x32xbf16>, vector<8x32xf32> -> vector<8x32xf32>
    %c0_15 = arith.constant 0 : index
    %c0_16 = arith.constant 0 : index
    %19 = vector.load %arg7[%c0_15, %c0_16] : memref<1x32xf32, #tpu.memory_space<vmem>>, vector<1x32xf32>
    %20 = vector.broadcast %19 : vector<1x32xf32> to vector<8x32xf32>
    %21 = arith.addf %18, %20 : vector<8x32xf32>
    %cst_17 = arith.constant 0.000000e+00 : f32
    %22 = vector.broadcast %cst_17 : f32 to vector<8x32xf32>
    %23 = arith.maximumf %21, %22 : vector<8x32xf32>
    %24 = arith.truncf %23 : vector<8x32xf32> to vector<8x32xbf16>
    %c0_18 = arith.constant 0 : index
    %c0_19 = arith.constant 0 : index
    %25 = vector.load %arg8[%c0_18, %c0_19] : memref<32x4xbf16, #tpu.memory_space<vmem>>, vector<32x4xbf16>
    %cst_20 = arith.constant dense<0.000000e+00> : vector<8x4xf32>
    %26 = tpu.matmul %24, %25, %cst_20 {dimension_numbers = #tpu.dot_dimension_numbers<[1], [0], [0], [1], [0, 0, 1, 1], [], []>} : vector<8x32xbf16>, vector<32x4xbf16>, vector<8x4xf32> -> vector<8x4xf32>
    %c0_21 = arith.constant 0 : index
    %c0_22 = arith.constant 0 : index
    %27 = vector.load %arg9[%c0_21, %c0_22] : memref<1x4xf32, #tpu.memory_space<vmem>>, vector<1x4xf32>
    %28 = vector.broadcast %27 : vector<1x4xf32> to vector<8x4xf32>
    %29 = arith.addf %26, %28 : vector<8x4xf32>
    %c0_23 = arith.constant 0 : index
    %c0_24 = arith.constant 0 : index
    %30 = vector.load %arg10[%c0_23, %c0_24] : memref<8x4xf32, #tpu.memory_space<vmem>>, vector<8x4xf32>
    tpu.vector_store %arg10[%c0_23, %c0_24], %29 {strides = array<i32>} : memref<8x4xf32, #tpu.memory_space<vmem>>, vector<8x4xf32>,
    return
  }
  func.func @transform_0(%arg0: i32) -> (i32, i32) {
    %c0_i32 = arith.constant 0 : i32
    %c0_i32_0 = arith.constant 0 : i32
    return %arg0, %c0_i32 : i32, i32
  }
  func.func @transform_1(%arg0: i32) -> (i32, i32) {
    %c0_i32 = arith.constant 0 : i32
    %c0_i32_0 = arith.constant 0 : i32
    %c0_i32_1 = arith.constant 0 : i32
    return %c0_i32, %c0_i32_0 : i32, i32
  }
  func.func @transform_2(%arg0: i32) -> (i32, i32) {
    %c0_i32 = arith.constant 0 : i32
    %c0_i32_0 = arith.constant 0 : i32
    %c0_i32_1 = arith.constant 0 : i32
    return %c0_i32, %c0_i32_0 : i32, i32
  }
  func.func @transform_3(%arg0: i32) -> (i32, i32) {
    %c0_i32 = arith.constant 0 : i32
    %c0_i32_0 = arith.constant 0 : i32
    %c0_i32_1 = arith.constant 0 : i32
    return %c0_i32, %c0_i32_0 : i32, i32
  }
  func.func @transform_4(%arg0: i32) -> (i32, i32) {
    %c0_i32 = arith.constant 0 : i32
    %c0_i32_0 = arith.constant 0 : i32
    %c0_i32_1 = arith.constant 0 : i32
    return %c0_i32, %c0_i32_0 : i32, i32
  }
  func.func @transform_5(%arg0: i32) -> (i32, i32) {
    %c0_i32 = arith.constant 0 : i32
    %c0_i32_0 = arith.constant 0 : i32
    %c0_i32_1 = arith.constant 0 : i32
    return %c0_i32, %c0_i32_0 : i32, i32
  }
  func.func @transform_6(%arg0: i32) -> (i32, i32) {
    %c0_i32 = arith.constant 0 : i32
    %c0_i32_0 = arith.constant 0 : i32
    %c0_i32_1 = arith.constant 0 : i32
    return %c0_i32, %c0_i32_0 : i32, i32
  }
  func.func @transform_7(%arg0: i32) -> (i32, i32) {
    %c0_i32 = arith.constant 0 : i32
    %c0_i32_0 = arith.constant 0 : i32
    %c0_i32_1 = arith.constant 0 : i32
    return %c0_i32, %c0_i32_0 : i32, i32
  }
  func.func @transform_8(%arg0: i32) -> (i32, i32) {
    %c0_i32 = arith.constant 0 : i32
    %c0_i32_0 = arith.constant 0 : i32
    %c0_i32_1 = arith.constant 0 : i32
    return %c0_i32, %c0_i32_0 : i32, i32
  }
  func.func @transform_9(%arg0: i32) -> (i32, i32) {
    %c0_i32 = arith.constant 0 : i32
    %c0_i32_0 = arith.constant 0 : i32
    return %arg0, %c0_i32 : i32, i32
  }
}

</mosaic_0001>

<bundles_post_ra>
// kernel: tpu_custom_call.1
= control target key start
LH: loop header
LB: loop body
LE: loop exit
PB: predicated region body
PF: predicated region fallthrough
CT: control target
= control target key end

     0   :  { %14 = vsyncpa [#allocation3], 0  ;;  %s613_s0 = inlined_call_operand.hbm [shape: bf16[8,16], index: 0, kind: input, shape index: {}]   ;;  %s614_s1 = inlined_call_operand.hbm [shape: bf16[16,32], index: 1, kind: input, shape index: {}]   ;;  %s615_s2 = inlined_call_operand.vmem [shape: f32[1,32], index: 2, kind: input, shape index: {}]   ;;  %s616_s3 = inlined_call_operand.vmem [shape: bf16[32,32], index: 3, kind: input, shape index: {}]   ;;  %s617_s4 = inlined_call_operand.hbm [shape: f32[1,32], index: 4, kind: input, shape index: {}]   ;;  %s618_s5 = inlined_call_operand.vmem [shape: bf16[32,32], index: 5, kind: input, shape index: {}]   ;;  %s619_s6 = inlined_call_operand.vmem [shape: f32[1,32], index: 6, kind: input, shape index: {}]   ;;  %s620_s7 = inlined_call_operand.vmem [shape: bf16[32,4], index: 7, kind: input, shape index: {}]   ;;  %s621_s8 = inlined_call_operand.vmem [shape: f32[1,4], index: 8, kind: input, shape index: {}]   ;;  %s622_s9 = inlined_call_operand.vmem [shape: f32[8,4], index: 9, kind: output, shape index: {}]  }
   0x1   :  { %15 = vsyncpa [#allocation5], 0  ;;  %s483_s30 = smov [#allocation4]   ;;  %s413_s13 = scalar_lea.hbm %s614_s1, 128 }
   0x2   :  { %s31_s10 = sshll.u32 %s483_s30, 4  ;;  %p414_p0 = scmp.ne.s32.totalorder %s614_s1, %s413_s13  ;;  %s32_s10 = int_to_ptr.vmem [resolvable:$true] %s31_s10 }
   0x3   :  { %p417_p1 = scmp.lt.u32.totalorder %s413_s13, %s614_s1 }
   0x5   :  { %p419_p2 = pnand %p417_p1, %p414_p0 }
   0x7   :  { %422 = shalt.err (!%p419_p2)
}
   0x8   :  { %s423_s18 = scalar_lea.vmem %s32_s10, 128  ;;  %p428_p4 = scmp.lt.s32.totalorder %s32_s10, %s32_s10 }
   0x9   :  { %p424_p3 = scmp.ne.s32.totalorder %s32_s10, %s423_s18  ;;  %p429_p5 = scmp.lt.s32.totalorder %s423_s18, %s423_s18 }
   0xb   :  { %p430_p6 = por %p429_p5, %p428_p4 }
   0xd   :  { %p431_p7 = pnand %p430_p6, %p424_p3 }
   0xf   :  { %434 = shalt.err (!%p431_p7)
}
  0x10   :  { %s484_s19 = smov 64   ;;  %s485_s20 = smov 4  }
  0x11   :  { %37 = dma.hbm_to_vmem [thread:$0]  %s614_s1, 128, %s32_s10, [#allocation5], %s484_s19, %s484_s19, %s485_s20  }
  0x12   :  { %s486_s23 = smov [#allocation2]   ;;  %s487_s25 = smov [#allocation6]  }
  0x13   :  { %s22_s24 = sshll.u32 %s486_s23, 4  ;;  %s48_s26 = sshll.u32 %s487_s25, 4  ;;  %s23_s24 = int_to_ptr.vmem [resolvable:$true] %s22_s24  ;;  %s49_s26 = int_to_ptr.vmem [resolvable:$true] %s48_s26 }
  0x14   :  { %s435_s29 = scalar_lea.hbm %s613_s0, 64 }
  0x15   :  { %p436_p8 = scmp.ne.s32.totalorder %s613_s0, %s435_s29  ;;  %p439_p9 = scmp.lt.u32.totalorder %s435_s29, %s613_s0 }
  0x17   :  { %p441_p10 = pnand %p439_p9, %p436_p8 }
  0x19   :  { %444 = shalt.err (!%p441_p10)
}
  0x1a   :  { %s445_s1 = scalar_lea.vmem %s23_s24, 64  ;;  %p450_p12 = scmp.lt.s32.totalorder %s23_s24, %s23_s24 }
  0x1b   :  { %p446_p11 = scmp.ne.s32.totalorder %s23_s24, %s445_s1  ;;  %p451_p13 = scmp.lt.s32.totalorder %s445_s1, %s445_s1 }
  0x1d   :  { %p452_p0 = por %p451_p13, %p450_p12 }
  0x1f   :  { %p453_p1 = pnand %p452_p0, %p446_p11 }
  0x21   :  { %456 = shalt.err (!%p453_p1)
}
  0x22   :  { %25 = dma.hbm_to_vmem [thread:$0]  %s613_s0, 64, %s23_s24, [#allocation3]  }
  0x23   :  { %s457_s17 = scalar_lea.hbm %s617_s4, 16 }
  0x24   :  { %p458_p2 = scmp.ne.s32.totalorder %s617_s4, %s457_s17  ;;  %p461_p3 = scmp.lt.u32.totalorder %s457_s17, %s617_s4 }
  0x26   :  { %p463_p4 = pnand %p461_p3, %p458_p2 }
  0x28   :  { %466 = shalt.err (!%p463_p4)
}
  0x29   :  { %s467_s22 = scalar_lea.vmem %s49_s26, 16  ;;  %s471_s23 = scalar_lea.vmem %s49_s26, 32 }
  0x2a   :  { %p468_p5 = scmp.ne.s32.totalorder %s49_s26, %s467_s22  ;;  %p472_p6 = scmp.lt.s32.totalorder %s49_s26, %s49_s26 }
  0x2b   :  { %p473_p7 = scmp.lt.s32.totalorder %s471_s23, %s467_s22 }
  0x2d   :  { %p474_p8 = por %p473_p7, %p472_p6 }
  0x2f   :  { %p475_p9 = pnand %p474_p8, %p468_p5 }
  0x31   :  { %478 = shalt.err (!%p475_p9)
}
  0x32   :  { %51 = dma.hbm_to_vmem [thread:$0]  %s617_s4, 16, %s49_s26, [#allocation5]  }
  0x33   :  { %479 = dma.done.wait [#allocation3], 64  }
  0x34   :  { %480 = vsyncadd [#allocation3], 4294967232 }
  0x35   :  { %481 = dma.done.wait [#allocation5], 144  }
  0x36   :  { %482 = vsyncadd [#allocation5], 4294967152  ;;  %v488_v0 = vmov 0.0   ;;  %vm489_vm0 = vmmov 0   ;;  %v406_v1 = vld [vmem:[#allocation4] sm:$0xff]   ;;  %vm86_vm1 = vcmask 130048  }
  0x37   :  { %369 = vmatprep.subr.bf16.mxu0 %v488_v0  ;;  %371 = vmatprep.mubr.msk.bf16.mxu0 %vm489_vm0, %v488_v0  ;;  %v70_v2 = vld [vmem:[#allocation2] sm:$0xf]  ;;  %v408_v4 = vld [vmem:[%s616_s3 + $0x8] sm:$0xff]   ;;  %vm155_vm2 = vcmask 261120   ;;  %vm335_vm3 = vcmask 31744  }
  0x38   :  { %375 = vmatprep.subr.bf16.mxu1 %v488_v0  ;;  %379 = vmatprep.mubr.msk.bf16.mxu1 %vm489_vm0, %v488_v0  ;;  %v407_v3 = vld [vmem:[%s616_s3] sm:$0xff]   ;;  %v410_v14 = vld [vmem:[%s618_s5 + $0x8] sm:$0xff]  }
  0x39   :  { %370 = vmatpush3.bf16.msra.mxu0 %v406_v1  ;;  %376 = vmatpush3.bf16.msra.mxu1 %v407_v3  ;;  %v409_v5 = vld [vmem:[%s618_s5] sm:$0xff]   ;;  %v346_v16 = vld [vmem:[#allocation6] ss:$0 sm:$0xff] }
  0x3a   :  { %383 = vmatprep.subr.bf16.mxu0 %v488_v0  ;;  %377 = vmatprep.subr.bf16.mxu1 %v488_v0  ;;  %v343_v6 = vld [vmem:[%s615_s2] ss:$0 sm:$0xff]  ;;  %v412_v24 = vld [vmem:[%s620_s7 + $0x8] sm:$0xff]  }
  0x3b   :  { %v411_v15 = vld [vmem:[%s620_s7] sm:$0xff]  }
  0x3c   :  { %372 = vmatmul.mubr.msk.bf16.vlgmr.msra.gmra.mrb[0].mxu0 %vm86_vm1, %v70_v2  ;;  %v350_v25 = vld [vmem:[%s619_s6] ss:$0 sm:$0xff] }
  0x3d   :  { %387 = vmatprep.mubr.msk.bf16.mxu0 %vm489_vm0, %v488_v0  ;;  %378 = vmatpush3.bf16.msra.mxu1 %v408_v4  ;;  %v354_v33 = vld [vmem:[%s621_s8] ss:$0 sm:$0xff] }
  0x3e   :  { %391 = vmatprep.subr.bf16.mxu1 %v488_v0  ;;  %384 = vmatpush3.bf16.msra.mxu0 %v409_v5 }
  0x3f   :  { %385 = vmatprep.subr.bf16.mxu0 %v488_v0 }
  0x42   :  { %386 = vmatpush3.bf16.msra.mxu0 %v410_v14 }
 0x10f   :  { %v124_v7 = vpop.f32.mrb[0].mxu0 }
 0x110   :  { %v125_v8 = vadd.f32 %v343_v6, %v124_v7  ;;  %v373_v9 = vpop.f32.mrb[1].mxu0 }
 0x111   :  { %v127_v10 = vpop.f32.mrb[2].mxu0 }
 0x112   :  { %v130_v11 = vmax.f32 %v125_v8, 0.0  ;;  %v374_v12 = vpop.f32.mrb[3].mxu0 }
 0x114   :  { %v131_v13 = vpack.c.bf16 %v130_v11, %v130_v11 }
 0x116   :  { %380 = vmatmul.mubr.msk.bf16.vlgmr.msra.gmra.mrb[0].mxu1 %vm155_vm2, %v131_v13 }
 0x117   :  { %395 = vmatprep.mubr.msk.bf16.mxu1 %vm489_vm0, %v488_v0  ;;  %392 = vmatpush3.bf16.msra.mxu1 %v411_v15 }
 0x118   :  { %393 = vmatprep.subr.bf16.mxu1 %v488_v0 }
 0x11b   :  { %394 = vmatpush3.bf16.msra.mxu1 %v412_v24 }
 0x1e9   :  { %v193_v17 = vpop.f32.mrb[0].mxu1 }
 0x1ea   :  { %v194_v18 = vadd.f32 %v346_v16, %v193_v17  ;;  %v381_v19 = vpop.f32.mrb[1].mxu1 }
 0x1eb   :  { %v196_v20 = vpop.f32.mrb[2].mxu1 }
 0x1ec   :  { %v199_v21 = vmax.f32 %v194_v18, 0.0  ;;  %v382_v22 = vpop.f32.mrb[3].mxu1 }
 0x1ee   :  { %v200_v23 = vpack.c.bf16 %v199_v21, %v199_v21 }
 0x1f0   :  { %388 = vmatmul.mubr.msk.bf16.vlgmr.msra.gmra.mrb[4].mxu0 %vm155_vm2, %v200_v23 }
 0x2c3   :  { %v261_v26 = vpop.f32.mrb[4].mxu0 }
 0x2c4   :  { %v262_v27 = vadd.f32 %v350_v25, %v261_v26  ;;  %v389_v28 = vpop.f32.mrb[5].mxu0 }
 0x2c5   :  { %v264_v29 = vpop.f32.mrb[6].mxu0 }
 0x2c6   :  { %v267_v30 = vmax.f32 %v262_v27, 0.0  ;;  %v390_v31 = vpop.f32.mrb[7].mxu0 }
 0x2c8   :  { %v268_v32 = vpack.c.bf16 %v267_v30, %v267_v30 }
 0x2ca   :  { %396 = vmatmul.mubr.msk.bf16.vlgmr.msra.gmra.mrb[4].mxu1 %vm155_vm2, %v268_v32 }
 0x39d   :  { %v329_v34 = vpop.f32.mrb[4].mxu1 }
 0x39e   :  { %v330_v35 = vadd.f32 %v354_v33, %v329_v34  ;;  %v397_v36 = vpop.f32.mrb[5].mxu1 }
 0x39f   :  { %v332_v37 = vpop.f32.mrb[6].mxu1 }
 0x3a0   :  { %336 = vst.msk [vmem:[%s622_s9] sm:$0xff] %vm335_vm3, %v330_v35  ;;  %v398_v38 = vpop.f32.mrb[7].mxu1 }
 0x3a1   :  { %341 = vsyncpa [#allocation3], 1 }
 0x3a2   :  { %342 = vsyncpa [#allocation5], 1 }

</bundles_post_ra>
